<compile_context>
chip_gen: v7x
topology: tpu7x:2x2x1
jax: 0.10.0
libtpu: 0.0.40
codegen_flags: <defaults>
</compile_context>

<pallas_src>
import math
from functools import partial

import numpy as np
import jax
import jax.numpy as jnp
from jax import lax
from jax.experimental import pallas as pl
from jax.experimental.pallas import tpu as pltpu


_MASK_VALUE = -1e30  # large finite negative (avoids inf-inf NaN risk in low precision)


# ---------------------------------------------------------------------------
# Pallas kernel: per-(b, head-group, key-tile) ProbSparse attention on top-u queries
# ---------------------------------------------------------------------------
def _prob_attn_kernel(q_ref, k_ref, v_ref, pos_ref, out_ref,
                      m_ref, l_ref, acc_ref, *,
                      scale, mask_flag, l_k_real, need_key_mask):
    # q_ref  : (1, G, u_pad, D)    selected (top-u, padded) queries
    # k_ref  : (1, G, tk,   D)     key tile
    # v_ref  : (1, G, tk,   D)     value tile
    # pos_ref: (1, G, u_pad, 1)    int32 original query positions (ProbMask)
    # out_ref: (1, 1, u_pad, G*D)  lane-dense: head g occupies lanes [g*D, (g+1)*D)
    # scratch: m_ref/l_ref (G,u_pad,1) f32, acc_ref (G,u_pad,D) f32 (online softmax)
    kstep = pl.program_id(2)

    @pl.when(kstep == 0)
    def _():
        m_ref[...] = jnp.full_like(m_ref, _MASK_VALUE)
        l_ref[...] = jnp.zeros_like(l_ref)
        acc_ref[...] = jnp.zeros_like(acc_ref)

    q = q_ref[0]                      # (G, u_pad, D)
    k = k_ref[0]                      # (G, tk, D)
    v = v_ref[0]                      # (G, tk, D)
    G, u_pad, D = q.shape
    tk = k.shape[1]

    # Fold the softmax temperature into the small Q tile (u_pad*D elements)
    # instead of scaling the (u_pad, tk) score tile.
    qs = q * jnp.asarray(scale, dtype=q.dtype)

    # scores[g] = Q_reduce[g] @ K[g]^T : contract over D, batched over heads
    # (MXU, f32 accumulation, no explicit K transpose).
    s = lax.dot_general(
        qs, k,
        dimension_numbers=(((2,), (2,)), ((0,), (0,))),
        preferred_element_type=jnp.float32)            # (G, u_pad, tk) f32

    if mask_flag or need_key_mask:
        key_idx = kstep * tk + lax.broadcasted_iota(jnp.int32, s.shape, 2)
        if mask_flag:
            pos = pos_ref[0]                            # (G, u_pad, 1) int32
            masked = key_idx > pos                      # ProbMask: keys strictly after query pos
            if need_key_mask:
                masked = masked | (key_idx >= l_k_real)
        else:
            masked = key_idx >= l_k_real                # only zero-padded keys
        s = jnp.where(masked, jnp.float32(_MASK_VALUE), s)

    # Flash-style online softmax across key tiles; statistics stay in f32.
    m_prev = m_ref[...]
    m_new = jnp.maximum(m_prev, jnp.max(s, axis=-1, keepdims=True))
    alpha = jnp.exp(m_prev - m_new)
    p = jnp.exp(s - m_new)
    l_ref[...] = alpha * l_ref[...] + jnp.sum(p, axis=-1, keepdims=True)
    acc_ref[...] = alpha * acc_ref[...] + lax.dot_general(
        p.astype(v.dtype), v,
        dimension_numbers=(((2,), (1,)), ((0,), (0,))),
        preferred_element_type=jnp.float32)             # (G, u_pad, D) f32
    m_ref[...] = m_new

    @pl.when(kstep == pl.num_programs(2) - 1)
    def _():
        # Normalize the small (G, u_pad, D) context (not the (.., tk) weights);
        # the reciprocal runs on the EUP slot.
        inv_l = pl.reciprocal(l_ref[...], approx=True)   # (G, u_pad, 1)
        ctx = (acc_ref[...] * inv_l).astype(out_ref.dtype)
        # Pack heads along the lane dim with per-head static lane-slice stores.
        for g in range(G):
            out_ref[0, 0, :, g * D:(g + 1) * D] = ctx[g]


# ---------------------------------------------------------------------------
# Tiling / VMEM helpers
# ---------------------------------------------------------------------------
def _round_up(x, m):
    return -(-x // m) * m


def _sublane_multiple(dtype):
    itemsize = jnp.dtype(dtype).itemsize
    return {4: 8, 2: 16, 1: 32}.get(itemsize, 8)


def _vmem_budget_and_limit():
    """Generation-aware VMEM sizing: ~108 MiB limit on 128 MiB parts, ~48 MiB on v7x."""
    cap = 64 * 1024 * 1024  # conservative fallback (v7x per-TC capacity)
    try:
        cap = int(pltpu.get_tpu_info().vmem_capacity_bytes) or cap
    except Exception:
        pass
    limit = max(32 * 1024 * 1024, min(int(cap * 0.85), cap - 16 * 1024 * 1024))
    budget = int(limit * 0.85)  # headroom for compiler temporaries
    return budget, limit


def _choose_tiles(B, H, L_K, D, u_pad, sub, in_itemsize, out_itemsize, budget):
    """Pick (heads per grid step G, key tile tk).

    Prefers the whole (sublane-rounded) key axis resident with as many heads per
    step as fit the VMEM budget, while keeping at least min(4, B*H) grid points
    so both v7x TensorCores get work; falls back to G=1 with a tiled key axis
    (online softmax) for long sequences.
    """
    lane = 128
    L_K_sub = _round_up(L_K, sub)
    d_pad = max(D, lane)

    def footprint(G, tk):
        kv = 2 * 2 * G * tk * d_pad * in_itemsize              # K, V (double-buffered)
        qb = 2 * G * u_pad * d_pad * in_itemsize                # Q (double-buffered)
        posb = 2 * G * u_pad * lane * 4                         # lane-1 int32 pos block
        outb = 2 * u_pad * max(G * D, lane) * out_itemsize      # packed output block
        scr = (2 * G * u_pad * lane + G * u_pad * d_pad) * 4    # m, l, acc scratch
        tmp = (3 * G * u_pad * max(tk, lane) + 2 * G * u_pad * d_pad) * 4
        return kv + qb + posb + outb + scr + tmp

    min_points = min(4, B * H)
    for G in sorted((g for g in range(1, H + 1) if H % g == 0), reverse=True):
        if B * (H // G) < min_points:
            continue
        if footprint(G, L_K_sub) <= budget:
            return G, L_K_sub
    # Long-sequence fallback: one head per step, tile the key axis.
    tk = L_K_sub
    while tk > sub and footprint(1, tk) > budget:
        tk = max(sub, _round_up(tk // 2, sub))
    return 1, tk


# ---------------------------------------------------------------------------
# pallas_call wrapper
# ---------------------------------------------------------------------------
def _prob_attn_pallas(q_red, k, v, pos, scale, mask_flag, G, tk, l_k_real, vmem_limit):
    B, H, u_pad, D = q_red.shape
    L_K_pad = k.shape[2]
    nk = L_K_pad // tk
    out_dtype = v.dtype
    kernel = partial(_prob_attn_kernel, scale=scale, mask_flag=mask_flag,
                     l_k_real=l_k_real, need_key_mask=(L_K_pad != l_k_real))

    cost = pl.CostEstimate(
        flops=4 * B * H * u_pad * L_K_pad * D,
        transcendentals=B * H * u_pad * L_K_pad,
        bytes_accessed=int(q_red.size * q_red.dtype.itemsize
                           + k.size * k.dtype.itemsize
                           + v.size * v.dtype.itemsize
                           + pos.size * pos.dtype.itemsize
                           + B * H * u_pad * D * jnp.dtype(out_dtype).itemsize))

    out = pl.pallas_call(
        kernel,
        out_shape=jax.ShapeDtypeStruct((B, H // G, u_pad, G * D), out_dtype),
        grid_spec=pltpu.PrefetchScalarGridSpec(
            num_scalar_prefetch=0,
            grid=(B, H // G, nk),
            in_specs=[
                pl.BlockSpec((1, G, u_pad, D), lambda b, hg, kk: (b, hg, 0, 0)),
                pl.BlockSpec((1, G, tk, D), lambda b, hg, kk: (b, hg, kk, 0)),
                pl.BlockSpec((1, G, tk, D), lambda b, hg, kk: (b, hg, kk, 0)),
                # TODO(synk): scalar-prefetch M_top into SMEM instead of a lane-1 VMEM block.
                pl.BlockSpec((1, G, u_pad, 1), lambda b, hg, kk: (b, hg, 0, 0)),
            ],
            out_specs=pl.BlockSpec((1, 1, u_pad, G * D), lambda b, hg, kk: (b, hg, 0, 0)),
            scratch_shapes=[
                pltpu.VMEM((G, u_pad, 1), jnp.float32),   # running max
                pltpu.VMEM((G, u_pad, 1), jnp.float32),   # running denominator
                pltpu.VMEM((G, u_pad, D), jnp.float32),   # running context
            ],
        ),
        compiler_params=pltpu.CompilerParams(
            dimension_semantics=("parallel", "parallel", "arbitrary"),
            vmem_limit_bytes=vmem_limit),
        cost_estimate=cost,
    )(q_red, k, v, pos)

    # Un-pack heads: (B, H//G, u_pad, G*D) -> (B, H, u_pad, D) (layout plumbing only).
    out = out.reshape(B, H // G, u_pad, G, D)
    out = jnp.transpose(out, (0, 1, 3, 2, 4)).reshape(B, H, u_pad, D)
    return out


# ---------------------------------------------------------------------------
# ProbAttention forward (JAX glue around the kernel)
# ---------------------------------------------------------------------------
class ProbAttention:
    def __init__(self, mask_flag=True, factor=5, scale=None,
                 attention_dropout=0.1, output_attention=False):
        self.factor = factor
        self.scale = scale
        self.mask_flag = mask_flag
        self.output_attention = output_attention
        # NOTE: self.dropout exists in the PyTorch module but is never applied in forward.

    def __call__(self, queries, keys, values, attn_mask, *, sample_key):
        B, L_Q, H, D = queries.shape
        _, L_K, _, _ = keys.shape

        # [B, L, H, D] -> [B, H, L, D]
        q = jnp.transpose(queries, (0, 2, 1, 3))
        k = jnp.transpose(keys, (0, 2, 1, 3))
        v = jnp.transpose(values, (0, 2, 1, 3))

        U_part = self.factor * int(np.ceil(np.log(L_K)))
        u = self.factor * int(np.ceil(np.log(L_Q)))
        U_part = U_part if U_part < L_K else L_K
        u = u if u < L_Q else L_Q

        # ---- _prob_QK sampling stage (random key sampling + top-u query selection) ----
        # TODO(synk): move this gather + einsum into a Pallas kernel with scalar-prefetched
        # index_sample so the (B,H,L_Q,U_part,D) K_sample tensor is never materialized.
        index_sample = jax.random.randint(sample_key, (L_Q, U_part), 0, L_K)
        K_sample = k[:, :, index_sample, :]                              # (B,H,L_Q,U_part,D)
        Q_K_sample = jnp.einsum('bhqd,bhqsd->bhqs', q, K_sample,
                                preferred_element_type=jnp.float32)      # f32 accumulation
        M = Q_K_sample.max(-1) - Q_K_sample.sum(-1) / L_K                # sparsity measure
        _, M_top = lax.top_k(M, u)                                       # (B,H,u) indices
        M_top = M_top.astype(jnp.int32)
        Q_reduce = jnp.take_along_axis(q, M_top[..., None], axis=2)      # (B,H,u,D)

        scale = self.scale if self.scale is not None else 1.0 / math.sqrt(D)

        # ---- sublane-align u (8 f32 / 16 bf16 / 32 int8); sentinel keeps pad rows benign ----
        sub = _sublane_multiple(q.dtype)
        u_pad = max(sub, _round_up(u, sub))
        pad = u_pad - u
        q_red = jnp.pad(Q_reduce, ((0, 0), (0, 0), (0, pad), (0, 0)))
        pos = jnp.pad(M_top, ((0, 0), (0, 0), (0, pad)),
                      constant_values=L_K - 1)[..., None]                # (B,H,u_pad,1)

        # ---- generation-aware tiling: heads per step + key tile ----
        budget, vmem_limit = _vmem_budget_and_limit()
        G, tk = _choose_tiles(B, H, L_K, D, u_pad, sub,
                              jnp.dtype(q_red.dtype).itemsize,
                              jnp.dtype(v.dtype).itemsize, budget)

        # Pad the key axis so the key-tile grid divides evenly; padded keys are
        # masked inside the kernel (key_idx >= L_K).
        L_K_pad = _round_up(L_K, tk)
        k_in, v_in = k, v
        if L_K_pad != L_K:
            kpad = ((0, 0), (0, 0), (0, L_K_pad - L_K), (0, 0))
            k_in = jnp.pad(k, kpad)
            v_in = jnp.pad(v, kpad)

        # ---- hot path in Pallas: Q_reduce @ K^T, ProbMask, online softmax, @ V ----
        attn_rows = _prob_attn_pallas(q_red, k_in, v_in, pos, scale,
                                      self.mask_flag, G, tk, L_K, vmem_limit)
        attn_rows = attn_rows[:, :, :u, :]                               # drop padding rows

        # ---- initial context + scatter of updated rows ----
        # TODO(synk): fold this scatter into the kernel via input_output_aliases and
        # scalar-prefetched M_top-driven output indexing to save a full-tensor RMW pass.
        L_V = v.shape[2]
        if self.mask_flag:
            assert L_Q == L_V
            context = jnp.cumsum(v, axis=2)                              # (B,H,L_Q,D)
        else:
            context = jnp.broadcast_to(
                v.mean(axis=2, keepdims=True), (B, H, L_Q, D))
        b_idx = jnp.arange(B)[:, None, None]
        h_idx = jnp.arange(H)[None, :, None]
        context = context.at[b_idx, h_idx, M_top, :].set(
            attn_rows.astype(context.dtype))

        attn = None
        # TODO(synk): output_attention=True path (dense L_V x L_V attention map fill)
        # is not emitted; default output_attention=False is implemented.

        # [B, H, L_Q, D] -> [B, L_Q, H, D]
        return jnp.transpose(context, (0, 2, 1, 3)), attn


# ---------------------------------------------------------------------------
if __name__ == "__main__":
    B, L, H, D = 2, 16, 4, 32   # small shapes consistent with the module's forward

    key = jax.random.PRNGKey(0)
    kq, kk, kv, ks = jax.random.split(key, 4)
    queries = jax.random.normal(kq, (B, L, H, D), dtype=jnp.float32)
    keys_ = jax.random.normal(kk, (B, L, H, D), dtype=jnp.float32)
    values = jax.random.normal(kv, (B, L, H, D), dtype=jnp.float32)

    # masked (causal ProbMask) path
    attn_masked = ProbAttention(mask_flag=True, factor=5, scale=None,
                                attention_dropout=0.1, output_attention=False)
    ctx_m, _ = attn_masked(queries, keys_, values, None, sample_key=ks)
    ctx_m = jax.block_until_ready(ctx_m)
    assert ctx_m.shape == (B, L, H, D)
    assert bool(jnp.all(jnp.isfinite(ctx_m)))

    # unmasked path
    attn_unmasked = ProbAttention(mask_flag=False, factor=5, scale=None,
                                  attention_dropout=0.1, output_attention=False)
    ctx_u, _ = attn_unmasked(queries, keys_, values, None, sample_key=ks)
    ctx_u = jax.block_until_ready(ctx_u)
    assert ctx_u.shape == (B, L, H, D)
    assert bool(jnp.all(jnp.isfinite(ctx_u)))

    print("KERNEL_OK")
</pallas_src>

<mosaic_0001>
module attributes {stable_mosaic.version = 11 : i64} {
  func.func @_prob_attn_kernel(%arg0: i32, %arg1: i32, %arg2: i32, %arg3: memref<1x2x16x32xf32, #tpu.memory_space<vmem>>, %arg4: memref<1x2x16x32xf32, #tpu.memory_space<vmem>>, %arg5: memref<1x2x16x32xf32, #tpu.memory_space<vmem>>, %arg6: memref<1x2x16x1xi32, #tpu.memory_space<vmem>>, %arg7: memref<1x1x16x64xf32, #tpu.memory_space<vmem>>, %arg8: memref<2x16x1xf32, #tpu.memory_space<vmem>>, %arg9: memref<2x16x1xf32, #tpu.memory_space<vmem>>, %arg10: memref<2x16x32xf32, #tpu.memory_space<vmem>>) attributes {dimension_semantics = [#tpu.dimension_semantics<parallel>, #tpu.dimension_semantics<parallel>, #tpu.dimension_semantics<arbitrary>], iteration_bounds = array<i64: 2, 2, 1>, scalar_prefetch = 0 : i64, scratch_operands = 3 : i64, tpu.core_type = #tpu.core_type<tc>, window_params = [{transform_indices = @transform_0, window_bounds = array<i64: 1, 2, 16, 32>}, {transform_indices = @transform_1, window_bounds = array<i64: 1, 2, 16, 32>}, {transform_indices = @transform_2, window_bounds = array<i64: 1, 2, 16, 32>}, {transform_indices = @transform_3, window_bounds = array<i64: 1, 2, 16, 1>}, {transform_indices = @transform_4, window_bounds = array<i64: 1, 1, 16, 64>}]} {
    %c0_i32 = arith.constant 0 : i32
    %0 = arith.cmpi eq, %arg2, %c0_i32 : i32
    %1 = arith.extui %0 : i1 to i32
    %c0_i32_0 = arith.constant 0 : i32
    %2 = arith.cmpi ne, %1, %c0_i32_0 : i32
    scf.if %2 {
      %cst_41 = arith.constant -1.000000e+30 : f32
      %47 = vector.broadcast %cst_41 : f32 to vector<2x16x1xf32>
      %c0_42 = arith.constant 0 : index
      %c0_43 = arith.constant 0 : index
      %c0_44 = arith.constant 0 : index
      %48 = vector.load %arg8[%c0_42, %c0_43, %c0_44] : memref<2x16x1xf32, #tpu.memory_space<vmem>>, vector<2x16x1xf32>
      tpu.vector_store %arg8[%c0_42, %c0_43, %c0_44], %47 {strides = array<i32>} : memref<2x16x1xf32, #tpu.memory_space<vmem>>, vector<2x16x1xf32>,
      %cst_45 = arith.constant 0.000000e+00 : f32
      %49 = vector.broadcast %cst_45 : f32 to vector<2x16x1xf32>
      %c0_46 = arith.constant 0 : index
      %c0_47 = arith.constant 0 : index
      %c0_48 = arith.constant 0 : index
      %50 = vector.load %arg9[%c0_46, %c0_47, %c0_48] : memref<2x16x1xf32, #tpu.memory_space<vmem>>, vector<2x16x1xf32>
      tpu.vector_store %arg9[%c0_46, %c0_47, %c0_48], %49 {strides = array<i32>} : memref<2x16x1xf32, #tpu.memory_space<vmem>>, vector<2x16x1xf32>,
      %cst_49 = arith.constant 0.000000e+00 : f32
      %51 = vector.broadcast %cst_49 : f32 to vector<2x16x32xf32>
      %c0_50 = arith.constant 0 : index
      %c0_51 = arith.constant 0 : index
      %c0_52 = arith.constant 0 : index
      %52 = vector.load %arg10[%c0_50, %c0_51, %c0_52] : memref<2x16x32xf32, #tpu.memory_space<vmem>>, vector<2x16x32xf32>
      tpu.vector_store %arg10[%c0_50, %c0_51, %c0_52], %51 {strides = array<i32>} : memref<2x16x32xf32, #tpu.memory_space<vmem>>, vector<2x16x32xf32>,
    } else {
    }
    %c0 = arith.constant 0 : index
    %c0_1 = arith.constant 0 : index
    %c0_2 = arith.constant 0 : index
    %c0_3 = arith.constant 0 : index
    %3 = vector.load %arg3[%c0, %c0_1, %c0_2, %c0_3] : memref<1x2x16x32xf32, #tpu.memory_space<vmem>>, vector<1x2x16x32xf32>
    %4 = vector.shape_cast %3 : vector<1x2x16x32xf32> to vector<2x16x32xf32>
    %c0_4 = arith.constant 0 : index
    %c0_5 = arith.constant 0 : index
    %c0_6 = arith.constant 0 : index
    %c0_7 = arith.constant 0 : index
    %5 = vector.load %arg4[%c0_4, %c0_5, %c0_6, %c0_7] : memref<1x2x16x32xf32, #tpu.memory_space<vmem>>, vector<1x2x16x32xf32>
    %6 = vector.shape_cast %5 : vector<1x2x16x32xf32> to vector<2x16x32xf32>
    %c0_8 = arith.constant 0 : index
    %c0_9 = arith.constant 0 : index
    %c0_10 = arith.constant 0 : index
    %c0_11 = arith.constant 0 : index
    %7 = vector.load %arg5[%c0_8, %c0_9, %c0_10, %c0_11] : memref<1x2x16x32xf32, #tpu.memory_space<vmem>>, vector<1x2x16x32xf32>
    %8 = vector.shape_cast %7 : vector<1x2x16x32xf32> to vector<2x16x32xf32>
    %cst = arith.constant 0.176776692 : f32
    %9 = vector.broadcast %cst : f32 to vector<2x16x32xf32>
    %10 = arith.mulf %4, %9 : vector<2x16x32xf32>
    %cst_12 = arith.constant dense<0.000000e+00> : vector<2x16x16xf32>
    %11 = tpu.matmul %10, %6, %cst_12 {dimension_numbers = #tpu.dot_dimension_numbers<[2], [2], [1], [1], [0, 0, 0, 1, 1, 1], [0], [0]>} : vector<2x16x32xf32>, vector<2x16x32xf32>, vector<2x16x16xf32> -> vector<2x16x16xf32>
    %c16_i32 = arith.constant 16 : i32
    %12 = arith.muli %arg2, %c16_i32 : i32
    %13 = tpu.iota {dimensions = array<i32: 2>} : vector<2x16x16xi32>
    %14 = vector.broadcast %12 : i32 to vector<2x16x16xi32>
    %15 = arith.addi %14, %13 : vector<2x16x16xi32>
    %c0_13 = arith.constant 0 : index
    %c0_14 = arith.constant 0 : index
    %c0_15 = arith.constant 0 : index
    %c0_16 = arith.constant 0 : index
    %16 = vector.load %arg6[%c0_13, %c0_14, %c0_15, %c0_16] : memref<1x2x16x1xi32, #tpu.memory_space<vmem>>, vector<1x2x16x1xi32>
    %17 = vector.shape_cast %16 : vector<1x2x16x1xi32> to vector<2x16x1xi32>
    %18 = vector.broadcast %17 : vector<2x16x1xi32> to vector<2x16x16xi32>
    %19 = arith.cmpi sgt, %15, %18 : vector<2x16x16xi32>
    %cst_17 = arith.constant -1.000000e+30 : f32
    %20 = vector.broadcast %cst_17 : f32 to vector<2x16x16xf32>
    %21 = arith.select %19, %20, %11 : vector<2x16x16xi1>, vector<2x16x16xf32>
    %c0_18 = arith.constant 0 : index
    %c0_19 = arith.constant 0 : index
    %c0_20 = arith.constant 0 : index
    %22 = vector.load %arg8[%c0_18, %c0_19, %c0_20] : memref<2x16x1xf32, #tpu.memory_space<vmem>>, vector<2x16x1xf32>
    %cst_21 = arith.constant dense<0xFF800000> : vector<2x16xf32>
    %23 = vector.multi_reduction <maximumf>, %21, %cst_21 [2] : vector<2x16x16xf32> to vector<2x16xf32>
    %24 = vector.shape_cast %23 : vector<2x16xf32> to vector<2x16x1xf32>
    %25 = arith.maximumf %22, %24 : vector<2x16x1xf32>
    %26 = arith.subf %22, %25 : vector<2x16x1xf32>
    %27 = math.exp %26 : vector<2x16x1xf32>
    %28 = vector.broadcast %25 : vector<2x16x1xf32> to vector<2x16x16xf32>
    %29 = arith.subf %21, %28 : vector<2x16x16xf32>
    %30 = math.exp %29 : vector<2x16x16xf32>
    %c0_22 = arith.constant 0 : index
    %c0_23 = arith.constant 0 : index
    %c0_24 = arith.constant 0 : index
    %31 = vector.load %arg9[%c0_22, %c0_23, %c0_24] : memref<2x16x1xf32, #tpu.memory_space<vmem>>, vector<2x16x1xf32>
    %32 = arith.mulf %27, %31 : vector<2x16x1xf32>
    %cst_25 = arith.constant dense<0.000000e+00> : vector<2x16xf32>
    %33 = vector.multi_reduction <add>, %30, %cst_25 [2] : vector<2x16x16xf32> to vector<2x16xf32>
    %34 = vector.shape_cast %33 : vector<2x16xf32> to vector<2x16x1xf32>
    %35 = arith.addf %32, %34 : vector<2x16x1xf32>
    %c0_26 = arith.constant 0 : index
    %c0_27 = arith.constant 0 : index
    %c0_28 = arith.constant 0 : index
    %36 = vector.load %arg9[%c0_26, %c0_27, %c0_28] : memref<2x16x1xf32, #tpu.memory_space<vmem>>, vector<2x16x1xf32>
    tpu.vector_store %arg9[%c0_26, %c0_27, %c0_28], %35 {strides = array<i32>} : memref<2x16x1xf32, #tpu.memory_space<vmem>>, vector<2x16x1xf32>,
    %c0_29 = arith.constant 0 : index
    %c0_30 = arith.constant 0 : index
    %c0_31 = arith.constant 0 : index
    %37 = vector.load %arg10[%c0_29, %c0_30, %c0_31] : memref<2x16x32xf32, #tpu.memory_space<vmem>>, vector<2x16x32xf32>
    %38 = vector.broadcast %27 : vector<2x16x1xf32> to vector<2x16x32xf32>
    %39 = arith.mulf %38, %37 : vector<2x16x32xf32>
    %cst_32 = arith.constant dense<0.000000e+00> : vector<2x16x32xf32>
    %40 = tpu.matmul %30, %8, %cst_32 {dimension_numbers = #tpu.dot_dimension_numbers<[2], [1], [1], [2], [0, 0, 0, 1, 1, 2], [0], [0]>} : vector<2x16x16xf32>, vector<2x16x32xf32>, vector<2x16x32xf32> -> vector<2x16x32xf32>
    %41 = arith.addf %39, %40 : vector<2x16x32xf32>
    %c0_33 = arith.constant 0 : index
    %c0_34 = arith.constant 0 : index
    %c0_35 = arith.constant 0 : index
    %42 = vector.load %arg10[%c0_33, %c0_34, %c0_35] : memref<2x16x32xf32, #tpu.memory_space<vmem>>, vector<2x16x32xf32>
    tpu.vector_store %arg10[%c0_33, %c0_34, %c0_35], %41 {strides = array<i32>} : memref<2x16x32xf32, #tpu.memory_space<vmem>>, vector<2x16x32xf32>,
    %c0_36 = arith.constant 0 : index
    %c0_37 = arith.constant 0 : index
    %c0_38 = arith.constant 0 : index
    %43 = vector.load %arg8[%c0_36, %c0_37, %c0_38] : memref<2x16x1xf32, #tpu.memory_space<vmem>>, vector<2x16x1xf32>
    tpu.vector_store %arg8[%c0_36, %c0_37, %c0_38], %25 {strides = array<i32>} : memref<2x16x1xf32, #tpu.memory_space<vmem>>, vector<2x16x1xf32>,
    %c0_i32_39 = arith.constant 0 : i32
    %44 = arith.cmpi eq, %arg2, %c0_i32_39 : i32
    %45 = arith.extui %44 : i1 to i32
    %c0_i32_40 = arith.constant 0 : i32
    %46 = arith.cmpi ne, %45, %c0_i32_40 : i32
    scf.if %46 {
      %c0_41 = arith.constant 0 : index
      %c0_42 = arith.constant 0 : index
      %c0_43 = arith.constant 0 : index
      %47 = vector.load %arg9[%c0_41, %c0_42, %c0_43] : memref<2x16x1xf32, #tpu.memory_space<vmem>>, vector<2x16x1xf32>
      %48 = tpu.reciprocal %47 {approx = true} : vector<2x16x1xf32> -> vector<2x16x1xf32>
      %c0_44 = arith.constant 0 : index
      %c0_45 = arith.constant 0 : index
      %c0_46 = arith.constant 0 : index
      %49 = vector.load %arg10[%c0_44, %c0_45, %c0_46] : memref<2x16x32xf32, #tpu.memory_space<vmem>>, vector<2x16x32xf32>
      %50 = vector.broadcast %48 : vector<2x16x1xf32> to vector<2x16x32xf32>
      %51 = arith.mulf %49, %50 : vector<2x16x32xf32>
      %52 = vector.extract_strided_slice %51 {offsets = [0, 0, 0], sizes = [1, 16, 32], strides = [1, 1, 1]} : vector<2x16x32xf32> to vector<1x16x32xf32>
      %53 = vector.shape_cast %52 : vector<1x16x32xf32> to vector<16x32xf32>
      %c0_47 = arith.constant 0 : index
      %c0_48 = arith.constant 0 : index
      %c0_49 = arith.constant 0 : index
      %c0_50 = arith.constant 0 : index
      %54 = vector.load %arg7[%c0_47, %c0_48, %c0_49, %c0_50] : memref<1x1x16x64xf32, #tpu.memory_space<vmem>>, vector<1x1x16x32xf32>
      %55 = vector.shape_cast %54 : vector<1x1x16x32xf32> to vector<16x32xf32>
      %56 = vector.shape_cast %53 : vector<16x32xf32> to vector<1x1x16x32xf32>
      tpu.vector_store %arg7[%c0_47, %c0_48, %c0_49, %c0_50], %56 {strides = array<i32>} : memref<1x1x16x64xf32, #tpu.memory_space<vmem>>, vector<1x1x16x32xf32>,
      %57 = vector.extract_strided_slice %51 {offsets = [1, 0, 0], sizes = [1, 16, 32], strides = [1, 1, 1]} : vector<2x16x32xf32> to vector<1x16x32xf32>
      %58 = vector.shape_cast %57 : vector<1x16x32xf32> to vector<16x32xf32>
      %c0_51 = arith.constant 0 : index
      %c0_52 = arith.constant 0 : index
      %c0_53 = arith.constant 0 : index
      %c32 = arith.constant 32 : index
      %59 = vector.load %arg7[%c0_51, %c0_52, %c0_53, %c32] : memref<1x1x16x64xf32, #tpu.memory_space<vmem>>, vector<1x1x16x32xf32>
      %60 = vector.shape_cast %59 : vector<1x1x16x32xf32> to vector<16x32xf32>
      %61 = vector.shape_cast %58 : vector<16x32xf32> to vector<1x1x16x32xf32>
      tpu.vector_store %arg7[%c0_51, %c0_52, %c0_53, %c32], %61 {strides = array<i32>} : memref<1x1x16x64xf32, #tpu.memory_space<vmem>>, vector<1x1x16x32xf32>,
    } else {
    }
    return
  }
  func.func @transform_0(%arg0: i32, %arg1: i32, %arg2: i32) -> (i32, i32, i32, i32) {
    %c0_i32 = arith.constant 0 : i32
    %c0_i32_0 = arith.constant 0 : i32
    %c0_i32_1 = arith.constant 0 : i32
    return %arg0, %arg1, %c0_i32, %c0_i32_0 : i32, i32, i32, i32
  }
  func.func @transform_1(%arg0: i32, %arg1: i32, %arg2: i32) -> (i32, i32, i32, i32) {
    %c0_i32 = arith.constant 0 : i32
    %c0_i32_0 = arith.constant 0 : i32
    return %arg0, %arg1, %arg2, %c0_i32 : i32, i32, i32, i32
  }
  func.func @transform_2(%arg0: i32, %arg1: i32, %arg2: i32) -> (i32, i32, i32, i32) {
    %c0_i32 = arith.constant 0 : i32
    %c0_i32_0 = arith.constant 0 : i32
    return %arg0, %arg1, %arg2, %c0_i32 : i32, i32, i32, i32
  }
  func.func @transform_3(%arg0: i32, %arg1: i32, %arg2: i32) -> (i32, i32, i32, i32) {
    %c0_i32 = arith.constant 0 : i32
    %c0_i32_0 = arith.constant 0 : i32
    %c0_i32_1 = arith.constant 0 : i32
    return %arg0, %arg1, %c0_i32, %c0_i32_0 : i32, i32, i32, i32
  }
  func.func @transform_4(%arg0: i32, %arg1: i32, %arg2: i32) -> (i32, i32, i32, i32) {
    %c0_i32 = arith.constant 0 : i32
    %c0_i32_0 = arith.constant 0 : i32
    %c0_i32_1 = arith.constant 0 : i32
    return %arg0, %arg1, %c0_i32, %c0_i32_0 : i32, i32, i32, i32
  }
}

</mosaic_0001>

<bundles_post_ra>
// kernel: tpu_custom_call.1
= control target key start
LH: loop header
LB: loop body
LE: loop exit
PB: predicated region body
PF: predicated region fallthrough
CT: control target
= control target key end

     0   :  { %s1935_s0 = inlined_call_operand.vmem [shape: f32[2,4,16,32], index: 0, kind: input, shape index: {}]   ;;  %s1936_s1 = inlined_call_operand.hbm [shape: f32[2,4,16,32], index: 1, kind: input, shape index: {}]   ;;  %s1937_s2 = inlined_call_operand.hbm [shape: f32[2,4,16,32], index: 2, kind: input, shape index: {}]   ;;  %s1938_s3 = inlined_call_operand.vmem [shape: s32[2,4,16,1], index: 3, kind: input, shape index: {}]   ;;  %s1939_s4 = inlined_call_operand.hbm [shape: f32[2,2,16,64], index: 4, kind: output, shape index: {}]  }
   0x1   :  { %1947 = sst [smem:[#allocation17_spill]] %s1936_s1 }
   0x2   :  { %9 = vsyncpa [#allocation6], 0 }
   0x3   :  { %11 = vsyncpa [#allocation6 + $0x1], 0 }
   0x4   :  { %12 = vsyncpa [#allocation9], 0 }
   0x5   :  { %14 = vsyncpa [#allocation9 + $0x1], 0 }
   0x6   :  { %15 = vsyncpa [#allocation7], 0 }
   0x7   :  { %17 = vsyncpa [#allocation7 + $0x1], 0  ;;  %s1571_s15 = smov 0   ;;  %s1573_s16 = smov 0  }
   0x8   :  { %s1575_s17 = smov 0   ;;  %s1577_s18 = smov 0  }
   0x9   :  { %s1579_s19 = smov 0   ;;  %s1581_s20 = smov 0  }
   0xa   :  { %s1583_s21 = smov 0   ;;  %s1585_s22 = smov 0  }
   0xb LB: > { %1948 = sst [smem:[#allocation14_spill]] %s1529_s21  ;;  %s1144_s23 = sadd.s32 4294967295, %s1533_s22   ;;  %s1533_s22 = sphi %s1585_s22, %s23_s22   ;;  %s1529_s21 = sphi %s1583_s21, %s1968_s21   ;;  %s1525_s20 = sphi %s1581_s20, %s1973_s20   ;;  %s1521_s19 = sphi %s1579_s19, %s1966_s19   ;;  %s1517_s18 = sphi %s1577_s18, %s1972_s18   ;;  %s1513_s17 = sphi %s1575_s17, %s1971_s17   ;;  %s1509_s16 = sphi %s1573_s16, %s1970_s16   ;;  %s1505_s15 = sphi %s1571_s15, %s1969_s15  }
   0xc   : > { %s1145_s24 = sadd.s32 4294967294, %s1533_s22   ;;  %s38_s25 = sadd.s32 1, %s1525_s20 }
   0xd   : > { %s42_s26 = sadd.s32 1, %s1529_s21  ;;  %p40_p0 = scmp.ge.s32.totalorder %s38_s25, 2 }
   0xe   : > { %s81_s27 = sadd.s32 1, %s1513_s17  ;;  %p88_p1 = scmp.ne.s32.totalorder %s1513_s17, %s1509_s16 }
   0xf   : > { %p89_p2 = scmp.eq.s32.totalorder %s1533_s22, 0  ;;  %s1975_s25 = smov (%p40_p0, %s38_s25), 0 }
  0x10   : > { %1949 = sst [smem:[#allocation15_spill]] %s1975_s25  ;;  %s1977_s26 = smov (!%p40_p0, %s42_s26), %s1529_s21 }
  0x11   : > { %s75_s28 = ssub.s32 %s1525_s20, %s1975_s25  ;;  %p1624_p3 = por %p89_p2, %p88_p1 }
  0x12   : > { %p44_p4 = scmp.ge.s32.totalorder %s1977_s26, 2  ;;  %p94_p5 = scmp.ne.s32.totalorder %s1509_s16, %s1505_s15 }
  0x13   : > { %p95_p6 = scmp.eq.s32.totalorder %s1144_s23, 0  ;;  %p178_p7 = scmp.eq.s32.totalorder %s1144_s23, 3 }
  0x14   : > { %s1979_s26 = smov (%p44_p4, %s1977_s26), 0  ;;  %p184_p10 = scmp.eq.s32.totalorder %s1145_s24, 3 }
  0x15   : > { %1951 = sst [smem:[#allocation16_spill]] %s1979_s26  ;;  %p1632_p8 = por %p95_p6, %p94_p5 }
  0x16   : > { %p1636_p9 = por %p178_p7, %p88_p1  ;;  %s74_s6 = ssub.s32 %s1529_s21, %s1979_s26 }
  0x17   : > { %s1952_s30 = scalar_select %p1632_p8, 1, 0 }
  0x18   : > { %s1953_s5 = scalar_select %p1636_p9, 1, 0 }
  0x19   : > { %s76_s7 = sor.u32 %s75_s28, %s74_s6  ;;  %p1642_p12 = por %p184_p10, %p94_p5 }
  0x1a   : > { %p79_p11 = scmp.eq.s32.totalorder %s76_s7, 0  ;;  %p1271_p13 = scmp.lt.s32.totalorder %s1533_s22, 4 }
  0x1b   : > { %s1954_s8 = scalar_select %p1642_p12, 1, 0 }
  0x1c   : > { %s1648_s9 = sand.u32 1, %s1513_s17   ;;  %s1188_s12 = sshll.u32 %s1525_s20, 2 }
  0x1d   : > { %s1651_s10 = scalar_select %p79_p11, %s1513_s17, %s81_s27  }
  0x1e   : > { %s1940_s11 = sshll.u32 %s1648_s9, 5  ;;  %s1151_s13 = sshll.u32 %s1529_s21, 3 }
  0x1f   : > { %s222_s14 = scalar_lea.vmem [#allocation5], %s1940_s11  ;;  %s1658_s24 = sadd.s32 %s1188_s12, %s1151_s13 }
  0x20   : > { %s234_s23 = sshll.u32 %s222_s14, 4  ;;  %s1941_s28 = sshll.u32 %s1658_s24, 7  ;;  %s1660_s23 = int_to_ptr.vmem [resolvable:$true] %s234_s23 }
  0x21   : > { %p1665_p0 = pnand %p1271_p13, %p1624_p3  ;;  %s1956_s1 = sld [smem:[#allocation17_spill]] }
  0x23   : > { %p1373_p2 = pneg %p1665_p0 }
  0x27   : > { %s1674_s11 = scalar_lea.hbm %s1956_s1, %s1941_s28  ;;  %s1376_s27 = scalar_lea.hbm %s1956_s1, 2048 }
  0x28   : > { %s1371_s13 = scalar_lea.hbm %s1674_s11, 512  ;;  %p1377_p5 = scmp.lt.u32.totalorder %s1674_s11, %s1956_s1 }
  0x29   : > { %p1372_p1 = scmp.ne.s32.totalorder %s1674_s11, %s1371_s13  ;;  %p1378_p6 = scmp.lt.u32.totalorder %s1376_s27, %s1371_s13 }
  0x2a   : > { %p1380_p10 = scmp.lt.u32.totalorder %s1371_s13, %s1674_s11 }
  0x2b   : > { %p1374_p3 = pnand %p1373_p2, %p1372_p1  ;;  %p1379_p7 = por %p1378_p6, %p1377_p5 }
  0x2d   : > { %p1375_p4 = pneg %p1374_p3  ;;  %p1381_p11 = por %p1380_p10, %p1379_p7 }
  0x2f   : > { %p1382_p13 = pnand %p1381_p11, %p1375_p4 }
  0x31   : > { %1385 = shalt.err (!%p1382_p13)
}
  0x32   : > { %s1386_s12 = scalar_lea.vmem %s1660_s23, 512  ;;  %s1535_s29 = smov [#allocation5]  }
  0x33   : > { %p1387_p1 = scmp.ne.s32.totalorder %s1660_s23, %s1386_s12  ;;  %s1391_s14 = sshll.u32 %s1535_s29, 4  ;;  %s1392_s14 = int_to_ptr.vmem [resolvable:$false] %s1391_s14 }
  0x34   : > { %s1393_s28 = scalar_lea.vmem %s1392_s14, 1024  ;;  %p1394_p9 = scmp.lt.s32.totalorder %s1660_s23, %s1392_s14 }
  0x35   : > { %p1389_p3 = pnand %p1387_p1, %p1373_p2  ;;  %p1395_p5 = scmp.lt.s32.totalorder %s1393_s28, %s1386_s12 }
  0x37   : > { %p1390_p12 = pneg %p1389_p3  ;;  %p1396_p6 = por %p1395_p5, %p1394_p9 }
  0x39   : > { %p1397_p7 = pnand %p1396_p6, %p1390_p12 }
  0x3b   : > { %1400 = shalt.err (!%p1397_p7)
}
  0x3c   : > { %s1536_s13 = smov 128   ;;  %s1537_s27 = smov 8  }
  0x3d   : > { %s1957_s12 = scalar_lea.sflag [#allocation6], %s1648_s9  ;;  %p1158_p9 = scmp.ge.s32.totalorder %s1533_s22, 1 }
  0x3e   : > { %1263 = dma.hbm_to_vmem [thread:$0]  (!%p1665_p0), %s1674_s11, 512, %s1660_s23, %s1957_s12, %s1536_s13, %s1536_s13, %s1537_s27  }
  0x3f   : > { %p282_p12 = scmp.lt.s32.totalorder %s1533_s22, 5  ;;  %s1959_s29 = sshll.u32 %s1658_s24, 7 }
  0x40   : > { %s1718_s1 = scalar_lea.hbm %s1937_s2, %s1959_s29  ;;  %s1960_s26 = sshll.u32 %s1648_s9, 5 }
  0x41   : > { %p1709_p4 = pnand %p1158_p9, %p282_p12  ;;  %s248_s25 = scalar_lea.vmem [#allocation8], %s1960_s26 }
  0x42   : > { %s260_s21 = sshll.u32 %s248_s25, 4  ;;  %s245_s11 = scalar_lea.sflag [#allocation9], %s1648_s9  ;;  %s1722_s21 = int_to_ptr.vmem [resolvable:$true] %s260_s21 }
  0x43   : > { %s1401_s23 = scalar_lea.hbm %s1718_s1, 512  ;;  %s1406_s29 = scalar_lea.hbm %s1937_s2, 2048 }
  0x44   : > { %p1402_p10 = scmp.ne.s32.totalorder %s1718_s1, %s1401_s23  ;;  %p1407_p1 = scmp.lt.u32.totalorder %s1718_s1, %s1937_s2 }
  0x45   : > { %p1408_p3 = scmp.lt.u32.totalorder %s1406_s29, %s1401_s23  ;;  %p1410_p6 = scmp.lt.u32.totalorder %s1401_s23, %s1718_s1 }
  0x46   : > { %p1404_p11 = pnand %p1402_p10, %p1373_p2 }
  0x47   : > { %p1409_p5 = por %p1408_p3, %p1407_p1 }
  0x48   : > { %p1405_p13 = pneg %p1404_p11 }
  0x49   : > { %p1411_p7 = por %p1410_p6, %p1409_p5 }
  0x4b   : > { %p1412_p9 = pnand %p1411_p7, %p1405_p13 }
  0x4d   : > { %1415 = shalt.err (!%p1412_p9)
}
  0x4e   : > { %s1416_s25 = scalar_lea.vmem %s1722_s21, 512  ;;  %s1538_s26 = smov [#allocation8]  }
  0x4f   : > { %p1417_p12 = scmp.ne.s32.totalorder %s1722_s21, %s1416_s25  ;;  %s1421_s24 = sshll.u32 %s1538_s26, 4  ;;  %s1422_s24 = int_to_ptr.vmem [resolvable:$false] %s1421_s24 }
  0x50   : > { %s1423_s12 = scalar_lea.vmem %s1422_s24, 1024  ;;  %p1424_p8 = scmp.lt.s32.totalorder %s1722_s21, %s1422_s24 }
  0x51   : > { %p1419_p10 = pnand %p1417_p12, %p1373_p2  ;;  %p1425_p1 = scmp.lt.s32.totalorder %s1423_s12, %s1416_s25 }
  0x53   : > { %p1420_p11 = pneg %p1419_p10  ;;  %p1426_p3 = por %p1425_p1, %p1424_p8 }
  0x55   : > { %p1427_p5 = pnand %p1426_p3, %p1420_p11 }
  0x57   : > { %1430 = shalt.err (!%p1427_p5)
}
  0x58   : > { %1266 = dma.hbm_to_vmem [thread:$0]  (!%p1665_p0), %s1718_s1, 512, %s1722_s21, %s245_s11, %s1536_s13, %s1536_s13, %s1537_s27  }
  0x59   : > { %286 = sbr.rel (%p1709_p4) target bundleno = 1042 (0x412), region = 36  ;;  %s1756_s23 = sand.u32 (!%p1709_p4), 1, %s1509_s16  }
  0x5a   : > { %s1159_s29 = sshll.u32 (!%p1709_p4), %s1756_s23, 5  ;;  %s289_s14 = scalar_lea.sflag (!%p1709_p4), [#allocation6], %s1756_s23 }
  0x5b   : > { %s292_s6 = scalar_lea.vmem (!%p1709_p4), [#allocation5], %s1159_s29  ;;  %p1961_p8 = scmp.ne.s32.totalorder (!%p1709_p4), %s1952_s30, 0 }
  0x60   : > { %1492 = dma.done.wait (%p1961_p8), %s289_s14, 512  }
  0x61   : > { %1494 = vsyncadd (%p1961_p8), %s289_s14, 4294966784  ;;  %s298_s1 = scalar_lea.sflag [#allocation9], %s1756_s23  ;;  %s1765_s21 = scalar_lea.vmem [#allocation8], %s1159_s29 }
  0x62   : > { %1496 = dma.done.wait (%p1961_p8), %s298_s1, 512  }
  0x63   : > { %1498 = vsyncadd (%p1961_p8), %s298_s1, 4294966784  ;;  %s1772_s9 = sshll.u32 %s1517_s18, 1  ;;  %p352_p0 = scmp.lt.s32.totalorder %s1521_s19, 1  ;;  %v1539_v0 = vmov 0   ;;  %vm390_vm0 = vcmask 261120   ;;  %v401_v2 = vld [vmem:[%s292_s6 + $0x10] sm:$0xff]  ;;  %v587_v22 = vlaneseq }
  0x64   : > { %p354_p2 = scmp.lt.s32.totalorder %s1772_s9, 3  ;;  %1345 = vset.pattern.permute.xlu0 %v1539_v0  ;;  %1346 = vset.pattern.permute.xlu1 %v1539_v0  ;;  %vm1780_vm1 = vmpackc.low %vm390_vm0, %vm390_vm0  ;;  %v402_v3 = vld [vmem:[%s292_s6 + $0x18] sm:$0xff]  ;;  %v399_v4 = vld [vmem:[%s292_s6] sm:$0xff]  ;;  %vm381_vm2 = vcmask 7168   ;;  %v1540_v20 = vmov -1e+30  }
  0x65   : > { %s353_s13 = scalar_select %p352_p0, %s1521_s19, 1  ;;  %v1240_v5 = vpack.c.bf16 %v402_v3, %v401_v2  ;;  %v400_v6 = vld [vmem:[%s292_s6 + $0x8] sm:$0xff]  ;;  %385 = vst.msk [vmem:[#allocation2 + $0x18] sm:$0xff] %vm381_vm2, %v1540_v20  ;;  %382 = vst.msk [vmem:[#allocation2] sm:$0xff] %vm381_vm2, %v1540_v20  ;;  %v588_v24 = vand.u32 127, %v587_v22  ;;  %vm619_vm5 = vcmask 130048  }
  0x66   : > { %s355_s27 = scalar_select %p354_p2, %s1772_s9, 3  ;;  %v1234_v7 = vpack.c.bf16 %v400_v6, %v399_v4  ;;  %383 = vst.msk [vmem:[#allocation2 + $0x8] sm:$0xff] %vm381_vm2, %v1540_v20  ;;  %384 = vst.msk [vmem:[#allocation2 + $0x10] sm:$0xff] %vm381_vm2, %v1540_v20  ;;  %v1541_v39 = vmov 0.0   ;;  %v405_v56 = vld [vmem:[%s1765_s21 + $0x10] sm:$0xff]  ;;  %v406_v57 = vld [vmem:[%s1765_s21 + $0x18] sm:$0xff] }
  0x67   : > { %s1164_s7 = sshll.u32 %s353_s13, 3  ;;  %1242 = vmatprep.subr.msk.bf16.mxu1 %vm1780_vm1, %v1240_v5  ;;  %389 = vst.msk [vmem:[#allocation3 + $0x18] sm:$0xff] %vm381_vm2, %v1541_v39  ;;  %386 = vst.msk [vmem:[#allocation3] sm:$0xff] %vm381_vm2, %v1541_v39  ;;  %v1250_v58 = vpack.c.bf16 %v406_v57, %v405_v56  ;;  %v403_v59 = vld [vmem:[%s1765_s21] sm:$0xff]  ;;  %v404_v60 = vld [vmem:[%s1765_s21 + $0x8] sm:$0xff]  ;;  %s1542_s14 = smov 32  }
  0x68   : > { %s1163_s11 = sshll.u32 %s355_s27, 1  ;;  %1245 = vmatpush3.bf16.xpose.msk.msra.mxu1 %vm1780_vm1, %v1240_v5  ;;  %1236 = vmatprep.subr.msk.bf16.mxu0 %vm1780_vm1, %v1234_v7  ;;  %387 = vst.msk [vmem:[#allocation3 + $0x8] sm:$0xff] %vm381_vm2, %v1541_v39  ;;  %388 = vst.msk [vmem:[#allocation3 + $0x10] sm:$0xff] %vm381_vm2, %v1541_v39  ;;  %v1246_v61 = vpack.c.bf16 %v404_v60, %v403_v59  ;;  %s1161_s6 = sshll.u32 %s1756_s23, 4  ;;  %vm960_vm8 = vcmask 523520  }
  0x69   : > { %s358_s18 = sadd.s32 %s1164_s7, %s1163_s11  ;;  %1239 = vmatpush3.bf16.xpose.msk.msra.mxu0 %vm1780_vm1, %v1234_v7  ;;  %391 = vst.msk [vmem:[#allocation4] sm:$0xff] %vm390_vm0, %v1541_v39  ;;  %392 = vst.msk [vmem:[#allocation4 + $0x8] sm:$0xff] %vm390_vm0, %v1541_v39  ;;  %1251 = vmatprep.subr.bf16.mxu1 %v1250_v58  ;;  %s350_s1 = scalar_lea.vmem [#allocation10], %s1161_s6 }
  0x6a   : > { %s1165_s30 = sshll.u32 %s358_s18, 3  ;;  %393 = vst.msk [vmem:[#allocation4 + $0x10] sm:$0xff] %vm390_vm0, %v1541_v39  ;;  %394 = vst.msk [vmem:[#allocation4 + $0x18] sm:$0xff] %vm390_vm0, %v1541_v39  ;;  %1247 = vmatprep.subr.bf16.mxu0 %v1246_v61  ;;  %s1184_s21 = sshll.u32 %s1521_s19, 2 }
  0x6b   : > { %s360_s26 = scalar_lea.vmem %s1935_s0, %s1165_s30  ;;  %s375_s29 = scalar_lea.vmem %s1938_s3, %s1165_s30 }
  0x6c   : > { %v397_v8 = vld [vmem:[%s360_s26 + $0x10] sm:$0xff]  ;;  %v395_v9 = vld [vmem:[%s360_s26] sm:$0xff]  ;;  %v398_v12 = vld [vmem:[%s360_s26 + $0x18] sm:$0xff]  ;;  %s976_s13 = sadd.s32 %s1184_s21, %s1772_s9  ;;  %s979_s7 = sshll.u32 %s350_s1, 4  ;;  %s1881_s7 = int_to_ptr.vmem [resolvable:$true] %s979_s7 }
  0x6d   : > { %v409_v10 = vmul.f32 0.17677669, %v397_v8  ;;  %v407_v11 = vmul.f32 0.17677669, %v395_v9  ;;  %v593_v13 = vld [vmem:[%s375_s29 + $0x10] sm:$0xff]  ;;  %v396_v14 = vld [vmem:[%s360_s26 + $0x8] sm:$0xff] }
  0x6e   : > { %v591_v15 = vld [vmem:[%s375_s29] sm:$0xff]  ;;  %602 = vperm.xlu0 %1345, %v593_v13   ;;  %v410_v16 = vmul.f32 0.17677669, %v398_v12  ;;  %v594_v17 = vld [vmem:[%s375_s29 + $0x18] sm:$0xff]  ;;  %v408_v18 = vmul.f32 0.17677669, %v396_v14 }
  0x6f   : > { %1217 = vmatprep.mubr.msk.f32.mxu1 %vm390_vm0, %v409_v10  ;;  %1210 = vmatprep.mubr.msk.f32.mxu0 %vm390_vm0, %v407_v11  ;;  %v592_v19 = vld [vmem:[%s375_s29 + $0x8] sm:$0xff]  ;;  %v1824_v40 = vld [vmem:[#allocation2 + $0x18] sm:$0xff]  ;;  %v617_v41 = vld [vmem:[#allocation2 + $0x10] sm:$0xff]  ;;  %s1185_s27 = sshll.u32 %s976_s13, 7  ;;  %s964_s28 = scalar_lea.sflag [#allocation7], %s1756_s23 }
  0x70   : > { %596 = vperm.xlu1 %1346, %v591_v15   ;;  %1218 = vmatmul.mubr.msk.f32.vlgmr.msra.gmra.mrb[0].mxu1 %vm390_vm0, %v410_v16  ;;  %v1834_v47 = vld [vmem:[#allocation2 + $0x8] sm:$0xff]  ;;  %v615_v51 = vld [vmem:[#allocation2] sm:$0xff]  ;;  %s1879_s30 = scalar_lea.hbm %s1939_s4, %s1185_s27  ;;  %s1431_s19 = scalar_lea.vmem %s1881_s7, 256 }
  0x71   : > { %1211 = vmatmul.mubr.msk.f32.vlgmr.msra.gmra.mrb[0].mxu0 %vm390_vm0, %v408_v18  ;;  %1253 = vmatpush3.bf16.msra.mxu1 %v1250_v58  ;;  %v709_v60 = vld [vmem:[#allocation4] sm:$0xff]  ;;  %p1432_p4 = scmp.ne.s32.totalorder %s1881_s7, %s1431_s19  ;;  %p1964_p13 = scmp.ne.s32.totalorder %s1953_s5, 0 }
  0x72   : > { %605 = vperm.xlu0 %1345, %v594_v17   ;;  %1249 = vmatpush3.bf16.msra.mxu0 %v1246_v61  ;;  %s1543_s9 = smov [#allocation10]  }
  0x73   : > { %p1433_p6 = pnand %p1432_p4, %p1964_p13  ;;  %s1435_s25 = sshll.u32 %s1543_s9, 4  ;;  %s1436_s25 = int_to_ptr.vmem [resolvable:$false] %s1435_s25 }
  0x74   : > { %599 = vperm.xlu1 %1346, %v592_v19   ;;  %s1437_s26 = scalar_lea.vmem %s1436_s25, 512  ;;  %p1438_p9 = scmp.lt.s32.totalorder %s1881_s7, %s1436_s25 }
  0x75   : > { %p1434_p7 = pneg %p1433_p6  ;;  %p1439_p12 = scmp.lt.s32.totalorder %s1437_s26, %s1431_s19 }
  0x77   : > { %p1440_p10 = por %p1439_p12, %p1438_p9 }
  0x79   : > { %p1441_p11 = pnand %p1440_p10, %p1434_p7 }
  0xed   : > { %v603_v21 = vpop.permute.xlu0 %602 }
  0xee   : > { %vm609_vm4 = vcmp.gt.s32.totalorder %v588_v24, %v603_v21 }
  0xef   : > { %v597_v23 = vpop.permute.xlu1 %596 }
  0xf0   : > { %vm607_vm7 = vcmp.gt.s32.totalorder %v588_v24, %v597_v23 }
  0xf1   : > { %v606_v25 = vpop.permute.xlu0 %605 }
  0xf2   : > { %vm610_vm3 = vcmp.gt.s32.totalorder %v588_v24, %v606_v25  ;;  %v683_v25 = vld [vmem:[#allocation3 + $0x18] sm:$0xff] }
  0xf3   : > { %v600_v26 = vpop.permute.xlu1 %599 }
  0xf4   : > { %vm608_vm6 = vcmp.gt.s32.totalorder %v588_v24, %v600_v26  ;;  %v682_v26 = vld [vmem:[#allocation3 + $0x10] sm:$0xff] }
 0x143   : > { %v1219_v27 = vpop.f32.mrb[0].mxu1 }
 0x144   : > { %v1806_v28 = vsel %vm610_vm3, -1e+30, %v1219_v27  ;;  %v577_v29 = vpop.f32.mrb[1].mxu1  ;;  %v1212_v30 = vpop.f32.mrb[0].mxu0 }
 0x145   : > { %v613_v31 = vsel %vm609_vm4, -1e+30, %v577_v29  ;;  %v629_v32 = vsel %vm619_vm5, %v1806_v28, -inf  ;;  %v1810_v33 = vsel %vm608_vm6, -1e+30, %v1212_v30  ;;  %v490_v34 = vpop.f32.mrb[1].mxu0 }
 0x146   : > { %630 = vmax.xlane.f32.xlu1 %v629_v32  ;;  %v626_v35 = vsel %vm619_vm5, %v613_v31, -inf  ;;  %v623_v36 = vsel %vm619_vm5, %v1810_v33, -inf  ;;  %v611_v37 = vsel %vm607_vm7, -1e+30, %v490_v34  ;;  %v681_v34 = vld [vmem:[#allocation3 + $0x8] sm:$0xff] }
 0x147   : > { %627 = vmax.xlane.f32.xlu0 %v626_v35  ;;  %v620_v38 = vsel %vm619_vm5, %v611_v37, -inf }
 0x14b   : > { %624 = vmax.xlane.f32.xlu0 %v623_v36 }
 0x14f   : > { %621 = vmax.xlane.f32.xlu0 %v620_v38  ;;  %v680_v38 = vld [vmem:[#allocation3] sm:$0xff] }
 0x1d3   : > { %v631_v42 = vpop.xlane.xlu1 %630 }
 0x1d4   : > { %v1827_v43 = vmax.f32 %v1824_v40, %v631_v42  ;;  %v628_v44 = vpop.xlane.xlu0 %627 }
 0x1d5   : > { %v634_v45 = vmax.f32 %v617_v41, %v628_v44 }
 0x1d6   : > { %v639_v46 = vsub.f32 %v1824_v40, %v1827_v43  ;;  %910 = vst.msk [vmem:[#allocation2 + $0x18] sm:$0xff] %vm381_vm2, %v1827_v43  ;;  %665 = vperm.xlu0 %1345, %v1827_v43  }
 0x1d7   : > { %v638_v48 = vsub.f32 %v617_v41, %v634_v45  ;;  %909 = vst.msk [vmem:[#allocation2 + $0x10] sm:$0xff] %vm381_vm2, %v634_v45  ;;  %660 = vperm.xlu1 %1346, %v634_v45  }
 0x1d8   : > { %v625_v49 = vpop.xlane.xlu0 %624  ;;  %v646_v20 = vmul.f32 1.442695, %v639_v46 }
 0x1d9   : > { %v1838_v50 = vmax.f32 %v1834_v47, %v625_v49  ;;  %v644_v14 = vmul.f32 1.442695, %v638_v48 }
 0x1db   : > { %v637_v52 = vsub.f32 %v1834_v47, %v1838_v50  ;;  %908 = vst.msk [vmem:[#allocation2 + $0x8] sm:$0xff] %vm381_vm2, %v1838_v50 }
 0x1dc   : > { %v622_v53 = vpop.xlane.xlu0 %621 }
 0x1dd   : > { %v632_v54 = vmax.f32 %v615_v51, %v622_v53  ;;  %v642_v24 = vmul.f32 1.442695, %v637_v52  ;;  %v711_v52 = vld [vmem:[#allocation4 + $0x10] sm:$0xff] }
 0x1df   : > { %v636_v55 = vsub.f32 %v615_v51, %v632_v54  ;;  %907 = vst.msk [vmem:[#allocation2] sm:$0xff] %vm381_vm2, %v632_v54  ;;  %650 = vperm.xlu1 %1346, %v632_v54  }
 0x1e1   : > { %v640_v21 = vmul.f32 1.442695, %v636_v55 }
 0x1e3   : > { %655 = vperm.xlu1 %1346, %v1838_v50   ;;  %v712_v50 = vld [vmem:[#allocation4 + $0x18] sm:$0xff] }
 0x255   : > { %v666_v62 = vpop.permute.xlu0 %665 }
 0x256   : > { %v671_v63 = vsub.f32 %v1806_v28, %v666_v62  ;;  %v661_v0 = vpop.permute.xlu1 %660 }
 0x257   : > { %v670_v1 = vsub.f32 %v613_v31, %v661_v0 }
 0x258   : > { %v678_v2 = vmul.f32 1.442695, %v671_v63 }
 0x259   : > { %v676_v3 = vmul.f32 1.442695, %v670_v1 }
 0x25a   : > { %1347 = vpow2.f32 %v678_v2 }
 0x25b   : > { %1349 = vpow2.f32 %v676_v3 }
 0x25e   : > { %v651_v4 = vpop.permute.xlu1 %650 }
 0x25f   : > { %v668_v5 = vsub.f32 %v611_v37, %v651_v4 }
 0x261   : > { %v672_v6 = vmul.f32 1.442695, %v668_v5 }
 0x262   : > { %v656_v7 = vpop.permute.xlu1 %655 }
 0x263   : > { %1351 = vpow2.f32 %v672_v6  ;;  %v669_v8 = vsub.f32 %v1810_v33, %v656_v7 }
 0x264   : > { %v1348_v9 = vpop.eup %1347 }
 0x265   : > { %v1350_v10 = vpop.eup %1349  ;;  %v674_v11 = vmul.f32 1.442695, %v669_v8  ;;  %v697_v12 = vsel %vm619_vm5, %v1348_v9, 0.0  ;;  %v710_v8 = vld [vmem:[#allocation4 + $0x8] sm:$0xff] }
 0x266   : > { %1231 = vmatprep.mubr.msk.f32.mxu1 %vm619_vm5, %v1350_v10  ;;  %698 = vadd.xlane.f32.xlu1 %v697_v12  ;;  %v694_v13 = vsel %vm619_vm5, %v1350_v10, 0.0 }
 0x267   : > { %1353 = vpow2.f32 %v674_v11  ;;  %1232 = vmatmul.mubr.msk.f32.vlgmr.msra.gmra.mrb[2].mxu1 %vm619_vm5, %v1348_v9  ;;  %695 = vadd.xlane.f32.xlu0 %v694_v13 }
 0x268   : > { %1355 = vpow2.f32 %v644_v14 }
 0x269   : > { %1357 = vpow2.f32 %v646_v20 }
 0x26a   : > { %1359 = vpow2.f32 %v640_v21 }
 0x26b   : > { %1361 = vpow2.f32 %v642_v24 }
 0x26d   : > { %v1352_v15 = vpop.eup %1351 }
 0x26e   : > { %1224 = vmatprep.mubr.msk.f32.mxu0 %vm619_vm5, %v1352_v15  ;;  %v688_v19 = vsel %vm619_vm5, %v1352_v15, 0.0 }
 0x271   : > { %v1354_v16 = vpop.eup %1353 }
 0x272   : > { %1225 = vmatmul.mubr.msk.f32.vlgmr.msra.gmra.mrb[2].mxu0 %vm619_vm5, %v1354_v16  ;;  %v691_v17 = vsel %vm619_vm5, %v1354_v16, 0.0  ;;  %v1356_v18 = vpop.eup %1355 }
 0x273   : > { %692 = vadd.xlane.f32.xlu0 %v691_v17  ;;  %v1358_v22 = vpop.eup %1357  ;;  %v686_v29 = vmul.f32 %v1356_v18, %v682_v26 }
 0x274   : > { %v1360_v23 = vpop.eup %1359  ;;  %v687_v27 = vmul.f32 %v1358_v22, %v683_v25 }
 0x275   : > { %v1362_v33 = vpop.eup %1361  ;;  %v684_v41 = vmul.f32 %v1360_v23, %v680_v38 }
 0x276   : > { %v685_v36 = vmul.f32 %v1362_v33, %v681_v34 }
 0x277   : > { %725 = vperm.xlu1 %1346, %v1356_v18   ;;  %689 = vadd.xlane.f32.xlu0 %v688_v19 }
 0x28d   : > { %730 = vperm.xlu0 %1345, %v1358_v22  }
 0x291   : > { %715 = vperm.xlu0 %1345, %v1360_v23  }
 0x2f3   : > { %v699_v28 = vpop.xlane.xlu1 %698 }
 0x2f4   : > { %v703_v30 = vadd.f32 %v699_v28, %v687_v27  ;;  %v696_v31 = vpop.xlane.xlu0 %695 }
 0x2f5   : > { %v702_v32 = vadd.f32 %v696_v31, %v686_v29 }
 0x2f6   : > { %708 = vst.msk [vmem:[#allocation3 + $0x18] sm:$0xff] %vm381_vm2, %v703_v30 }
 0x2f7   : > { %707 = vst.msk [vmem:[#allocation3 + $0x10] sm:$0xff] %vm381_vm2, %v702_v32  ;;  %v726_v53 = vpop.permute.xlu1 %725 }
 0x2f8   : > { %v735_v55 = vmul.f32 %v726_v53, %v711_v52 }
 0x2fd   : > { %v917_v39 = vld [vmem:[#allocation3 + $0x18] sm:$0xff] }
 0x2fe   : > { %v916_v35 = vld [vmem:[#allocation3 + $0x10] sm:$0xff] }
 0x2ff   : > { %1363 = vrcp.f32 %v916_v35 }
 0x300   : > { %v693_v37 = vpop.xlane.xlu0 %692  ;;  %1365 = vrcp.f32 %v917_v39 }
 0x301   : > { %v701_v40 = vadd.f32 %v693_v37, %v685_v36 }
 0x303   : > { %706 = vst.msk [vmem:[#allocation3 + $0x8] sm:$0xff] %vm381_vm2, %v701_v40 }
 0x304   : > { %v690_v42 = vpop.xlane.xlu0 %689 }
 0x305   : > { %v700_v43 = vadd.f32 %v690_v42, %v684_v41 }
 0x307   : > { %705 = vst.msk [vmem:[#allocation3] sm:$0xff] %vm381_vm2, %v700_v43 }
 0x309   : > { %v1364_v44 = vpop.eup %1363 }
 0x30a   : > { %938 = vperm.xlu1 %1346, %v1364_v44   ;;  %v915_v45 = vld [vmem:[#allocation3 + $0x8] sm:$0xff]  ;;  %v1366_v46 = vpop.eup %1365 }
 0x30b   : > { %1367 = vrcp.f32 %v915_v45 }
 0x30c   : > { %v731_v51 = vpop.permute.xlu0 %730 }
 0x30d   : > { %v736_v54 = vmul.f32 %v731_v51, %v712_v50 }
 0x30e   : > { %943 = vperm.xlu1 %1346, %v1366_v46   ;;  %v914_v47 = vld [vmem:[#allocation3] sm:$0xff] }
 0x30f   : > { %1369 = vrcp.f32 %v914_v47 }
 0x310   : > { %v716_v61 = vpop.permute.xlu0 %715 }
 0x311   : > { %v733_v62 = vmul.f32 %v716_v61, %v709_v60 }
 0x312   : > { %720 = vperm.xlu1 %1346, %v1362_v33  }
 0x315   : > { %v1368_v48 = vpop.eup %1367 }
 0x316   : > { %933 = vperm.xlu1 %1346, %v1368_v48  }
 0x319   : > { %v1370_v49 = vpop.eup %1369 }
 0x31a   : > { %928 = vperm.xlu0 %1345, %v1370_v49  }
 0x33a   : > { %v1233_v56 = vpop.f32.mrb[2].mxu1 }
 0x33b   : > { %v902_v57 = vadd.f32 %v1233_v56, %v736_v54  ;;  %v890_v58 = vpop.f32.mrb[3].mxu1 }
 0x33c   : > { %v901_v59 = vadd.f32 %v890_v58, %v735_v55 }
 0x33d   : > { %906 = vst.msk [vmem:[#allocation4 + $0x18] sm:$0xff] %vm390_vm0, %v902_v57 }
 0x33e   : > { %905 = vst.msk [vmem:[#allocation4 + $0x10] sm:$0xff] %vm390_vm0, %v901_v59 }
 0x344   : > { %v925_v5 = vld [vmem:[#allocation4 + $0x18] sm:$0xff] }
 0x345   : > { %v1226_v63 = vpop.f32.mrb[2].mxu0  ;;  %v924_v2 = vld [vmem:[#allocation4 + $0x10] sm:$0xff] }
 0x346   : > { %v809_v0 = vpop.f32.mrb[3].mxu0 }
 0x347   : > { %v899_v1 = vadd.f32 %v809_v0, %v733_v62 }
 0x349   : > { %903 = vst.msk [vmem:[#allocation4] sm:$0xff] %vm390_vm0, %v899_v1 }
 0x350   : > { %v922_v12 = vld [vmem:[#allocation4] sm:$0xff] }
 0x389   : > { %v939_v3 = vpop.permute.xlu1 %938 }
 0x38a   : > { %v948_v4 = vmul.f32 %v939_v3, %v924_v2 }
 0x38c   : > { %954 = vrot.lane.b32.xlu0 %v948_v4, %s1542_s14 }
 0x38d   : > { %v944_v6 = vpop.permute.xlu1 %943 }
 0x38e   : > { %v949_v7 = vmul.f32 %v944_v6, %v925_v5 }
 0x390   : > { %956 = vrot.lane.b32.xlu1 %v949_v7, %s1542_s14 }
 0x391   : > { %v721_v9 = vpop.permute.xlu1 %720 }
 0x392   : > { %v734_v10 = vmul.f32 %v721_v9, %v710_v8 }
 0x394   : > { %v900_v11 = vadd.f32 %v1226_v63, %v734_v10 }
 0x395   : > { %v934_v16 = vpop.permute.xlu1 %933 }
 0x396   : > { %904 = vst.msk [vmem:[#allocation4 + $0x8] sm:$0xff] %vm390_vm0, %v900_v11 }
 0x399   : > { %v929_v13 = vpop.permute.xlu0 %928 }
 0x39a   : > { %v946_v14 = vmul.f32 %v929_v13, %v922_v12 }
 0x39c   : > { %950 = vst.msk [vmem:[%s350_s1] sm:$0xff] %vm390_vm0, %v946_v14 }
 0x39d   : > { %v923_v15 = vld [vmem:[#allocation4 + $0x8] sm:$0xff] }
 0x39e   : > { %v947_v17 = vmul.f32 %v934_v16, %v923_v15 }
 0x3a0   : > { %951 = vst.msk [vmem:[%s350_s1 + $0x8] sm:$0xff] %vm390_vm0, %v947_v17 }
 0x3fe   : > { %v955_v18 = vpop.permute.xlu0 %954 }
 0x3ff   : > { %961 = vst.msk [vmem:[%s350_s1] sm:$0xff] %vm960_vm8, %v955_v18 }
 0x402   : > { %v957_v19 = vpop.permute.xlu1 %956 }
 0x403   : > { %962 = vst.msk [vmem:[%s350_s1 + $0x8] sm:$0xff] %vm960_vm8, %v957_v19 }
 0x404   : > { %1444 = shalt.err (!%p1441_p11)
}
 0x405   : > { %s1445_s24 = scalar_lea.hbm %s1879_s30, 256  ;;  %s1449_s14 = scalar_lea.hbm %s1939_s4, 1024 }
 0x406   : > { %p1446_p1 = scmp.ne.s32.totalorder %s1879_s30, %s1445_s24  ;;  %p1450_p8 = scmp.lt.u32.totalorder %s1879_s30, %s1939_s4 }
 0x407   : > { %p1451_p0 = scmp.lt.u32.totalorder %s1449_s14, %s1445_s24  ;;  %p1453_p4 = scmp.lt.u32.totalorder %s1445_s24, %s1879_s30 }
 0x408   : > { %p1447_p3 = pnand %p1446_p1, %p1964_p13 }
 0x409   : > { %p1452_p2 = por %p1451_p0, %p1450_p8 }
 0x40a   : > { %p1448_p5 = pneg %p1447_p3 }
 0x40b   : > { %p1454_p6 = por %p1453_p4, %p1452_p2 }
 0x40d   : > { %p1455_p7 = pnand %p1454_p6, %p1448_p5 }
 0x40f   : > { %1458 = shalt.err (!%p1455_p7)
}
 0x410   : > { %s1544_s21 = smov 128   ;;  %s1545_s13 = smov 8  }
 0x411   : > { %1258 = dma.vmem_to_hbm [thread:$0]  (%p1964_p13), %s1881_s7, 256, %s1879_s30, %s964_s28, %s1544_s21, %s1544_s21, %s1545_s13  }
 0x412 PF: > { %p1272_p9 = scmp.ge.s32.totalorder %s1533_s22, 2  ;;  %s994_s27 = sand.u32 1, %s1505_s15  }
 0x413   : > { %p1965_p12 = scmp.ne.s32.totalorder %s1954_s8, 0  ;;  %s995_s11 = scalar_lea.sflag [#allocation7], %s994_s27 }
 0x415   : > { %p1268_p10 = pnand %p1272_p9, %p1965_p12 }
 0x417   : > { %1500 = dma.done.wait (!%p1268_p10), %s995_s11, 256  }
 0x418   : > { %1502 = vsyncadd (!%p1268_p10), %s995_s11, 4294967040  ;;  %s23_s22 = sadd.s32 1, %s1533_s22   ;;  %s1966_s19 = sld [smem:[#allocation14_spill]] }
 0x419   : > { %p20_p11 = scmp.ge.s32.totalorder %s23_s22, 6   ;;  %s1967_s5 = sld [smem:[#allocation15_spill]] }
 0x41a   : > { %s1968_s21 = sld [smem:[#allocation16_spill]]  ;;  %s1969_s15 = smov %s1509_s16 }
 0x41b   : > { %s1970_s16 = smov %s1513_s17  ;;  %s1971_s17 = smov %s1651_s10 }
 0x41c   : > { %s1972_s18 = smov %s1525_s20  ;;  %22 = sbr.rel (!%p20_p11) target bundleno = 11 (0xb), region = 108 }
 0x41f   : > { %s1973_s20 = smov %s1967_s5 }
 0x423   :  { %1000 = vsyncpa [#allocation6], 1 }
 0x424   :  { %1002 = vsyncpa [#allocation6 + $0x1], 1 }
 0x425   :  { %1003 = vsyncpa [#allocation9], 1 }
 0x426   :  { %1005 = vsyncpa [#allocation9 + $0x1], 1 }
 0x427   :  { %1006 = vsyncpa [#allocation7], 1 }
 0x428   :  { %1008 = vsyncpa [#allocation7 + $0x1], 1 }

</bundles_post_ra>
